<compile_context>
chip_gen: v6e
topology: v6e:2x2x1
jax: 0.10.0
libtpu: 0.0.40
codegen_flags: <defaults>
</compile_context>

<pallas_src>
import jax
import jax.numpy as jnp
from jax.experimental import pallas as pl
from jax.experimental.pallas import tpu as pltpu


def _gae_kernel(a_ref, x_ref, w1_ref, b1_ref, w2c_ref, b2s_ref, o_ref):
    # a_ref:   (R*N, N) stacked per-relation normalized adjacency
    # x_ref:   (N, F)   node features (shared across relations)
    # w1_ref:  (F, H), b1_ref: (1, H)
    # w2c_ref: (1, H)   == W2.sum(axis=1) as a lane-dense row
    # b2s_ref: SMEM (1,) == b2.sum()
    # o_ref:   (R, N)
    R, N = o_ref.shape

    a = a_ref[...]                                                    # (R*N, N)

    # Layer 1: X @ W1 once, then one tall MXU op for all relations.
    xw = jnp.dot(x_ref[...], w1_ref[...],
                 preferred_element_type=jnp.float32)                  # (N, H)
    h = jnp.maximum(
        jnp.dot(a, xw, preferred_element_type=jnp.float32) + b1_ref[...],
        0.0)                                                          # (R*N, H)

    # Layer 2 with the embed-dim sum folded in: VPU mul + lane reduce
    # (no one-column MXU matmul).
    hw = jnp.sum(h * w2c_ref[...], axis=-1, keepdims=True)            # (R*N, 1)

    # Second hop per relation; result is already in (R, N) output layout.
    a3 = a.reshape(R, N, N)                                           # (R, N, N)
    hw3 = hw.reshape(R, 1, N)                                         # (R, 1, N)
    o_ref[...] = jnp.sum(a3 * hw3, axis=-1) + b2s_ref[0]              # (R, N)


def edge_feat_gae_forward(a_hat, x, w1, b1, w2, b2):
    """a_hat: (R, N, N) per-relation normalized adjacency, x: (N, F) -> (R, N)."""
    R, N, _ = a_hat.shape
    F = x.shape[1]
    H = w1.shape[1]

    # Stacked adjacency: relation r occupies rows [r*N, (r+1)*N). Free reshape.
    a_stack = a_hat.reshape(R * N, N)

    # Fold the final embedding-dim sum into the second layer (exact rewrite).
    w2_rowsum = jnp.sum(w2, axis=1)[None, :].astype(jnp.float32)      # (1, H)
    b2_sum = jnp.sum(b2).reshape(1).astype(jnp.float32)               # (1,) -> SMEM

    out = pl.pallas_call(
        _gae_kernel,
        out_shape=jax.ShapeDtypeStruct((R, N), jnp.float32),
        in_specs=[
            pl.BlockSpec(memory_space=pltpu.MemorySpace.VMEM),   # a_stack
            pl.BlockSpec(memory_space=pltpu.MemorySpace.VMEM),   # x
            pl.BlockSpec(memory_space=pltpu.MemorySpace.VMEM),   # w1
            pl.BlockSpec(memory_space=pltpu.MemorySpace.VMEM),   # b1
            pl.BlockSpec(memory_space=pltpu.MemorySpace.VMEM),   # w2 col-sum row
            pl.BlockSpec(memory_space=pltpu.MemorySpace.SMEM),   # b2 sum scalar
        ],
        out_specs=pl.BlockSpec(memory_space=pltpu.MemorySpace.VMEM),
    )(a_stack, x, w1, b1, w2_rowsum, b2_sum)

    return out


def build_norm_adj(ei, n, ew=None):
    """Dense GCN-normalized adjacency (add_self_loops=True, symmetric norm).

    ei: (2, E) int32 [source; target]. Matches PyG gcn_norm with edge
    weights (default 1) and self-loop fill value 1 (no pre-existing loops).
    """
    row, col = ei[0], ei[1]
    if ew is None:
        ew = jnp.ones(row.shape, jnp.float32)
    a = jnp.zeros((n, n), jnp.float32).at[col, row].add(ew)
    a = a + jnp.eye(n, dtype=jnp.float32)
    deg = a.sum(axis=1)
    dinv = jnp.where(deg > 0, jax.lax.rsqrt(deg), 0.0)
    return dinv[:, None] * a * dinv[None, :]


def reference_forward(a_hat, x, w1, b1, w2, b2):
    def one(a):
        h = jnp.maximum(a @ (x @ w1) + b1, 0.0)
        z = a @ (h @ w2) + b2
        return z.sum(axis=-1)
    return jax.vmap(one)(a_hat)


if __name__ == "__main__":
    # Small deterministic shapes.
    N = 16          # nodes
    FEAT = 8        # feat_dim
    HID = 32        # hidden_dim
    EMB = 16        # embed_dim
    R = 8           # number of stacked edge_indices; E == R (see note above)
    E = R

    key = jax.random.PRNGKey(0)
    k_x, k_w1, k_w2, k_row, k_off = jax.random.split(key, 5)

    x = jax.random.normal(k_x, (N, FEAT), jnp.float32)

    # Deterministic parameter init (glorot-ish scale, zero bias).
    w1 = jax.random.normal(k_w1, (FEAT, HID), jnp.float32) * (2.0 / (FEAT + HID)) ** 0.5
    b1 = jnp.zeros((1, HID), jnp.float32)
    w2 = jax.random.normal(k_w2, (HID, EMB), jnp.float32) * (2.0 / (HID + EMB)) ** 0.5
    b2 = jnp.zeros((1, EMB), jnp.float32)

    # eis: (R, 2, E) int32, no self-loops (cols offset from rows).
    rows = jax.random.randint(k_row, (R, E), 0, N, jnp.int32)
    offs = jax.random.randint(k_off, (R, E), 1, N, jnp.int32)
    cols = (rows + offs) % N
    eis = jnp.stack([rows, cols], axis=1)   # (R, 2, E)

    # Glue: dense normalized adjacency per relation (ews=None -> weights 1).
    a_hat = jax.vmap(lambda ei: build_norm_adj(ei, N))(eis)   # (R, N, N)

    out = edge_feat_gae_forward(a_hat, x, w1, b1, w2, b2)
    out = jax.block_until_ready(out)

    ref = reference_forward(a_hat, x, w1, b1, w2, b2)
    assert out.shape == (R, N)
    assert jnp.allclose(out, ref, atol=1e-4, rtol=1e-4), "mismatch vs reference"

    print("KERNEL_OK")
</pallas_src>

<mosaic_0001>
module attributes {stable_mosaic.version = 11 : i64} {
  func.func @_gae_kernel(%arg0: memref<128x16xf32, #tpu.memory_space<vmem>>, %arg1: memref<16x8xf32, #tpu.memory_space<vmem>>, %arg2: memref<8x32xf32, #tpu.memory_space<vmem>>, %arg3: memref<1x32xf32, #tpu.memory_space<vmem>>, %arg4: memref<1x32xf32, #tpu.memory_space<vmem>>, %arg5: memref<1xf32, #tpu.memory_space<smem>>, %arg6: memref<8x16xf32, #tpu.memory_space<vmem>>) attributes {dimension_semantics = [], scalar_prefetch = 0 : i64, scratch_operands = 0 : i64, tpu.core_type = #tpu.core_type<tc>} {
    %c0 = arith.constant 0 : index
    %c0_0 = arith.constant 0 : index
    %0 = vector.load %arg0[%c0, %c0_0] : memref<128x16xf32, #tpu.memory_space<vmem>>, vector<128x16xf32>
    %c0_1 = arith.constant 0 : index
    %c0_2 = arith.constant 0 : index
    %1 = vector.load %arg1[%c0_1, %c0_2] : memref<16x8xf32, #tpu.memory_space<vmem>>, vector<16x8xf32>
    %c0_3 = arith.constant 0 : index
    %c0_4 = arith.constant 0 : index
    %2 = vector.load %arg2[%c0_3, %c0_4] : memref<8x32xf32, #tpu.memory_space<vmem>>, vector<8x32xf32>
    %cst = arith.constant dense<0.000000e+00> : vector<16x32xf32>
    %3 = tpu.matmul %1, %2, %cst {dimension_numbers = #tpu.dot_dimension_numbers<[1], [0], [0], [1], [0, 0, 1, 1], [], []>} : vector<16x8xf32>, vector<8x32xf32>, vector<16x32xf32> -> vector<16x32xf32>
    %cst_5 = arith.constant dense<0.000000e+00> : vector<128x32xf32>
    %4 = tpu.matmul %0, %3, %cst_5 {dimension_numbers = #tpu.dot_dimension_numbers<[1], [0], [0], [1], [0, 0, 1, 1], [], []>} : vector<128x16xf32>, vector<16x32xf32>, vector<128x32xf32> -> vector<128x32xf32>
    %c0_6 = arith.constant 0 : index
    %c0_7 = arith.constant 0 : index
    %5 = vector.load %arg3[%c0_6, %c0_7] : memref<1x32xf32, #tpu.memory_space<vmem>>, vector<1x32xf32>
    %6 = vector.broadcast %5 : vector<1x32xf32> to vector<128x32xf32>
    %7 = arith.addf %4, %6 : vector<128x32xf32>
    %cst_8 = arith.constant 0.000000e+00 : f32
    %8 = vector.broadcast %cst_8 : f32 to vector<128x32xf32>
    %9 = arith.maximumf %7, %8 : vector<128x32xf32>
    %c0_9 = arith.constant 0 : index
    %c0_10 = arith.constant 0 : index
    %10 = vector.load %arg4[%c0_9, %c0_10] : memref<1x32xf32, #tpu.memory_space<vmem>>, vector<1x32xf32>
    %11 = vector.broadcast %10 : vector<1x32xf32> to vector<128x32xf32>
    %12 = arith.mulf %9, %11 : vector<128x32xf32>
    %cst_11 = arith.constant dense<0.000000e+00> : vector<128xf32>
    %13 = vector.multi_reduction <add>, %12, %cst_11 [1] : vector<128x32xf32> to vector<128xf32>
    %14 = vector.shape_cast %13 : vector<128xf32> to vector<128x1xf32>
    %15 = vector.shape_cast %0 : vector<128x16xf32> to vector<8x16x16xf32>
    %16 = vector.shape_cast %14 : vector<128x1xf32> to vector<8x1x16xf32>
    %17 = vector.broadcast %16 : vector<8x1x16xf32> to vector<8x16x16xf32>
    %18 = arith.mulf %15, %17 : vector<8x16x16xf32>
    %cst_12 = arith.constant dense<0.000000e+00> : vector<8x16xf32>
    %19 = vector.multi_reduction <add>, %18, %cst_12 [2] : vector<8x16x16xf32> to vector<8x16xf32>
    %c0_13 = arith.constant 0 : index
    %20 = memref.load %arg5[%c0_13] : memref<1xf32, #tpu.memory_space<smem>>
    %21 = vector.broadcast %20 : f32 to vector<8x16xf32>
    %22 = arith.addf %19, %21 : vector<8x16xf32>
    %c0_14 = arith.constant 0 : index
    %c0_15 = arith.constant 0 : index
    %23 = vector.load %arg6[%c0_14, %c0_15] : memref<8x16xf32, #tpu.memory_space<vmem>>, vector<8x16xf32>
    tpu.vector_store %arg6[%c0_14, %c0_15], %22 {strides = array<i32>} : memref<8x16xf32, #tpu.memory_space<vmem>>, vector<8x16xf32>,
    return
  }
}

</mosaic_0001>

<bundles_post_ra>
// kernel: tpu_custom_call.1
= control target key start
LH: loop header
LB: loop body
LE: loop exit
PB: predicated region body
PF: predicated region fallthrough
CT: control target
= control target key end

     0   :  { %vm44_vm0 = vcmask 64512   ;;  %s1170_s0 = inlined_call_operand.vmem [shape: f32[128,16], index: 0, kind: input, shape index: {}]   ;;  %s1171_s1 = inlined_call_operand.vmem [shape: f32[16,8], index: 1, kind: input, shape index: {}]   ;;  %s1172_s2 = inlined_call_operand.vmem [shape: f32[8,32], index: 2, kind: input, shape index: {}]   ;;  %s1173_s3 = inlined_call_operand.vmem [shape: f32[1,32], index: 3, kind: input, shape index: {}]   ;;  %s1174_s4 = inlined_call_operand.vmem [shape: f32[1,32], index: 4, kind: input, shape index: {}]   ;;  %s1175_s5 = inlined_call_operand.<no memory space> [shape: f32[1], index: 5, kind: input, shape index: {}]   ;;  %s1176_s6 = inlined_call_operand.hbm [shape: f32[8,16], index: 6, kind: output, shape index: {}]  }
   0x1   :  { %v43_v0 = vld [vmem:[%s1172_s2] sm:$0xff]  ;;  %v42_v2 = vld [vmem:[%s1171_s1 + $0x8] sm:$0xff] }
   0x2   :  { %v41_v1 = vld [vmem:[%s1171_s1] sm:$0xff]  ;;  %804 = vmatprep.subr.mxu0 %v43_v0 }
   0x3   :  { %806 = vmatprep.mubr.msk.f32.mxu0 %vm44_vm0, %v41_v1 }
   0x4   :  { %12 = vsyncpa [#allocation4], 0  ;;  %805 = vmatpush3.msra.mxu0 %v43_v0  ;;  %v912_v3 = vld [vmem:[%s1170_s0] sm:$0xff]  ;;  %vm133_vm1 = vcmask 130048   ;;  %v917_v4 = vld [vmem:[%s1170_s0 + $0x30] sm:$0xff]  ;;  %vm366_vm2 = vcmask 261120  }
   0x5   :  { %807 = vmatmul.mubr.msk.f32.vlgmr.msra.gmra.mxu0 %vm44_vm0, %v42_v2  ;;  %822 = vmatprep.mubr.msk.f32.mxu1 %vm133_vm1, %v917_v4  ;;  %v926_v7 = vld [vmem:[%s1170_s0 + $0x8] sm:$0xff]  ;;  %v931_v8 = vld [vmem:[%s1170_s0 + $0x38] sm:$0xff]  ;;  %v936_v9 = vld [vmem:[%s1170_s0 + $0x10] sm:$0xff]  ;;  %vm442_vm3 = vcmask 130112   ;;  %vm507_vm4 = vcmask 1041409   ;;  %vm508_vm5 = vcmask 1042434  }
   0x6   :  { %813 = vmatprep.mubr.msk.f32.mxu0 %vm133_vm1, %v912_v3  ;;  %v941_v10 = vld [vmem:[%s1170_s0 + $0x40] sm:$0xff]  ;;  %v952_v11 = vld [vmem:[%s1170_s0 + $0x18] sm:$0xff]  ;;  %v959_v12 = vld [vmem:[%s1170_s0 + $0x48] sm:$0xff]  ;;  %vm510_vm6 = vcmask 1043459   ;;  %vm512_vm7 = vcmask 1044484   ;;  %vm514_vm8 = vcmask 1045509  }
   0x7   :  { %v964_v13 = vld [vmem:[%s1170_s0 + $0x20] sm:$0xff]  ;;  %v969_v14 = vld [vmem:[%s1170_s0 + $0x50] sm:$0xff]  ;;  %v980_v15 = vld [vmem:[%s1170_s0 + $0x28] sm:$0xff]  ;;  %vm516_vm9 = vcmask 1046534   ;;  %vm518_vm10 = vcmask 1047559  }
   0x8   :  { %v987_v16 = vld [vmem:[%s1170_s0 + $0x58] sm:$0xff]  ;;  %v992_v17 = vld [vmem:[%s1170_s0 + $0x60] sm:$0xff]  ;;  %v1003_v18 = vld [vmem:[%s1170_s0 + $0x68] sm:$0xff] }
   0x9   :  { %v1008_v19 = vld [vmem:[%s1170_s0 + $0x70] sm:$0xff]  ;;  %v1017_v20 = vld [vmem:[%s1170_s0 + $0x78] sm:$0xff]  ;;  %v1024_v21 = vld [vmem:[%s1173_s3] ss:$0 sm:$0xff] }
   0xa   :  { %v1033_v32 = vld [vmem:[%s1174_s4] ss:$0 sm:$0xff] }
  0xc5   :  { %v808_v5 = vpop.f32.mrf.mxu0 }
  0xc6   :  { %809 = vmatprep.subr.mxu0 %v808_v5  ;;  %837 = vmatprep.subr.mxu1 %v808_v5 }
  0xc7   :  { %v117_v6 = vpop.f32.mrf.mxu0  ;;  %810 = vmatpush3.msra.mxu0 %v808_v5  ;;  %839 = vmatpush3.msra.mxu1 %v808_v5 }
  0xc8   :  { %811 = vmatprep.subr.mxu0 %v117_v6  ;;  %838 = vmatprep.subr.mxu1 %v117_v6 }
  0xc9   :  { %812 = vmatpush3.msra.mxu0 %v117_v6  ;;  %840 = vmatpush3.msra.mxu1 %v117_v6 }
  0xca   :  { %814 = vmatmul.mubr.msk.f32.vlgmr.msra.gmra.mxu0 %vm133_vm1, %v926_v7  ;;  %823 = vmatmul.mubr.msk.f32.vlgmr.msra.gmra.mxu1 %vm133_vm1, %v931_v8 }
  0xcb   :  { %816 = vmatprep.mubr.msk.f32.mxu0 %vm133_vm1, %v936_v9  ;;  %825 = vmatprep.mubr.msk.f32.mxu1 %vm133_vm1, %v941_v10 }
  0xce   :  { %817 = vmatmul.mubr.msk.f32.gmra.mxu0 %vm133_vm1, %v952_v11  ;;  %826 = vmatmul.mubr.msk.f32.gmra.mxu1 %vm133_vm1, %v959_v12 }
  0xcf   :  { %819 = vmatprep.mubr.msk.f32.mxu0 %vm133_vm1, %v964_v13  ;;  %828 = vmatprep.mubr.msk.f32.mxu1 %vm133_vm1, %v969_v14 }
  0xd2   :  { %820 = vmatmul.mubr.msk.f32.gmra.mxu0 %vm133_vm1, %v980_v15  ;;  %829 = vmatmul.mubr.msk.f32.gmra.mxu1 %vm133_vm1, %v987_v16 }
  0xd3   :  { %831 = vmatprep.mubr.msk.f32.mxu1 %vm133_vm1, %v992_v17 }
  0xd6   :  { %832 = vmatmul.mubr.msk.f32.gmra.mxu1 %vm133_vm1, %v1003_v18 }
  0xd7   :  { %834 = vmatprep.mubr.msk.f32.mxu1 %vm133_vm1, %v1008_v19 }
  0xda   :  { %835 = vmatmul.mubr.msk.f32.gmra.mxu1 %vm133_vm1, %v1017_v20 }
 0x18a   :  { %v815_v22 = vpop.f32.mrf.mxu0  ;;  %v824_v23 = vpop.f32.mrf.mxu1 }
 0x18b   :  { %v254_v24 = vadd.f32 %v815_v22, %v1024_v21  ;;  %v284_v25 = vadd.f32 %v824_v23, %v1024_v21 }
 0x18c   :  { %v248_v26 = vpop.f32.mrf.mxu0  ;;  %v278_v27 = vpop.f32.mrf.mxu1 }
 0x18d   :  { %v328_v28 = vmax.f32 %v254_v24, 0.0  ;;  %v334_v29 = vmax.f32 %v284_v25, 0.0  ;;  %v249_v30 = vadd.f32 %v1024_v21, %v248_v26  ;;  %v279_v31 = vadd.f32 %v1024_v21, %v278_v27 }
 0x18e   :  { %v818_v33 = vpop.f32.mrf.mxu0  ;;  %v827_v34 = vpop.f32.mrf.mxu1 }
 0x18f   :  { %v327_v35 = vmax.f32 %v249_v30, 0.0  ;;  %v264_v36 = vadd.f32 %v818_v33, %v1024_v21  ;;  %v294_v37 = vadd.f32 %v827_v34, %v1024_v21  ;;  %v357_v39 = vmul.f32 %v1033_v32, %v334_v29 }
 0x190   :  { %v258_v38 = vpop.f32.mrf.mxu0  ;;  %v351_v40 = vmul.f32 %v1033_v32, %v328_v28  ;;  %v288_v41 = vpop.f32.mrf.mxu1  ;;  %v333_v42 = vmax.f32 %v279_v31, 0.0 }
 0x191   :  { %v330_v43 = vmax.f32 %v264_v36, 0.0  ;;  %v259_v44 = vadd.f32 %v1024_v21, %v258_v38  ;;  %v336_v45 = vmax.f32 %v294_v37, 0.0  ;;  %v388_v46 = vsel %vm366_vm2, %v357_v39, 0.0 }
 0x192   :  { %v370_v47 = vsel %vm366_vm2, %v351_v40, 0.0  ;;  %v289_v48 = vadd.f32 %v1024_v21, %v288_v41  ;;  %v350_v49 = vmul.f32 %v1033_v32, %v327_v35  ;;  %v821_v50 = vpop.f32.mrf.mxu0  ;;  %v830_v51 = vpop.f32.mrf.mxu1  ;;  %389 = vadd.xlane.f32.xlu1 %v388_v46  ;;  %v356_v62 = vmul.f32 %v1033_v32, %v333_v42 }
 0x193   :  { %371 = vadd.xlane.f32.xlu0 %v370_v47  ;;  %v353_v52 = vmul.f32 %v1033_v32, %v330_v43  ;;  %v359_v53 = vmul.f32 %v1033_v32, %v336_v45  ;;  %v274_v54 = vadd.f32 %v821_v50, %v1024_v21  ;;  %v329_v59 = vmax.f32 %v259_v44, 0.0 }
 0x194   :  { %v268_v55 = vpop.f32.mrf.mxu0  ;;  %v298_v56 = vpop.f32.mrf.mxu1  ;;  %v335_v60 = vmax.f32 %v289_v48, 0.0  ;;  %v367_v61 = vsel %vm366_vm2, %v350_v49, 0.0  ;;  %v304_v1 = vadd.f32 %v830_v51, %v1024_v21  ;;  %v385_v23 = vsel %vm366_vm2, %v356_v62, 0.0 }
 0x195   :  { %v376_v57 = vsel %vm366_vm2, %v353_v52, 0.0  ;;  %v269_v58 = vadd.f32 %v1024_v21, %v268_v55  ;;  %v332_v0 = vmax.f32 %v274_v54, 0.0  ;;  %v299_v2 = vadd.f32 %v1024_v21, %v298_v56 }
 0x196   :  { %v833_v63 = vpop.f32.mrf.mxu1  ;;  %377 = vadd.xlane.f32.xlu1 %v376_v57  ;;  %v394_v5 = vsel %vm366_vm2, %v359_v53, 0.0  ;;  %v352_v24 = vmul.f32 %v1033_v32, %v329_v59  ;;  %v358_v25 = vmul.f32 %v1033_v32, %v335_v60  ;;  %v338_v27 = vmax.f32 %v304_v1, 0.0 }
 0x197   :  { %368 = vadd.xlane.f32.xlu0 %v367_v61  ;;  %v331_v6 = vmax.f32 %v269_v58, 0.0  ;;  %v337_v28 = vmax.f32 %v299_v2, 0.0  ;;  %v314_v29 = vadd.f32 %v833_v63, %v1024_v21  ;;  %v355_v30 = vmul.f32 %v1033_v32, %v332_v0 }
 0x198   :  { %v308_v22 = vpop.f32.mrf.mxu1  ;;  %v373_v35 = vsel %vm366_vm2, %v352_v24, 0.0  ;;  %v391_v36 = vsel %vm366_vm2, %v358_v25, 0.0  ;;  %v361_v39 = vmul.f32 %v1033_v32, %v338_v27  ;;  %v431_v56 = vlaneseq }
 0x199   :  { %v309_v31 = vadd.f32 %v1024_v21, %v308_v22  ;;  %v354_v33 = vmul.f32 %v1033_v32, %v331_v6  ;;  %v340_v37 = vmax.f32 %v314_v29, 0.0  ;;  %v382_v38 = vsel %vm366_vm2, %v355_v30, 0.0 }
 0x19a   :  { %v836_v26 = vpop.f32.mrf.mxu1  ;;  %395 = vadd.xlane.f32.xlu1 %v394_v5  ;;  %v360_v40 = vmul.f32 %v1033_v32, %v337_v28  ;;  %v400_v45 = vsel %vm366_vm2, %v361_v39, 0.0  ;;  %v432_v57 = vand.u32 127, %v431_v56  ;;  %v434_v58 = vshrl.u32 %v431_v56, 7 }
 0x19b   :  { %386 = vadd.xlane.f32.xlu0 %v385_v23  ;;  %v339_v41 = vmax.f32 %v309_v31, 0.0  ;;  %v379_v42 = vsel %vm366_vm2, %v354_v33, 0.0  ;;  %v324_v43 = vadd.f32 %v836_v26, %v1024_v21  ;;  %v363_v46 = vmul.f32 %v1033_v32, %v340_v37 }
 0x19c   :  { %v318_v34 = vpop.f32.mrf.mxu1  ;;  %v397_v49 = vsel %vm366_vm2, %v360_v40, 0.0  ;;  %v437_v59 = vadd.s32 4294967288, %v432_v57  ;;  %v1081_v63 = vsub.s32 %v432_v57, %v434_v58 }
 0x19d   :  { %v319_v44 = vadd.f32 %v1024_v21, %v318_v34  ;;  %v342_v47 = vmax.f32 %v324_v43, 0.0  ;;  %v362_v50 = vmul.f32 %v1033_v32, %v339_v41  ;;  %v406_v51 = vsel %vm366_vm2, %v363_v46, 0.0 }
 0x19e   :  { %374 = vadd.xlane.f32.xlu1 %v373_v35  ;;  %v1079_v62 = vsub.s32 %v437_v59, %v434_v58 }
 0x19f   :  { %392 = vadd.xlane.f32.xlu0 %v391_v36  ;;  %v341_v48 = vmax.f32 %v319_v44, 0.0  ;;  %v403_v52 = vsel %vm366_vm2, %v362_v50, 0.0  ;;  %v365_v21 = vmul.f32 %v1033_v32, %v342_v47 }
 0x1a1   :  { %v364_v53 = vmul.f32 %v1033_v32, %v341_v48  ;;  %v412_v54 = vsel %vm366_vm2, %v365_v21, 0.0 }
 0x1a2   :  { %383 = vadd.xlane.f32.xlu1 %v382_v38 }
 0x1a3   :  { %380 = vadd.xlane.f32.xlu0 %v379_v42  ;;  %v409_v55 = vsel %vm366_vm2, %v364_v53, 0.0 }
 0x1a6   :  { %401 = vadd.xlane.f32.xlu1 %v400_v45 }
 0x1a7   :  { %398 = vadd.xlane.f32.xlu0 %v397_v49 }
 0x1aa   :  { %407 = vadd.xlane.f32.xlu1 %v406_v51 }
 0x1ab   :  { %404 = vadd.xlane.f32.xlu0 %v403_v52 }
 0x1ae   :  { %413 = vadd.xlane.f32.xlu1 %v412_v54 }
 0x1af   :  { %410 = vadd.xlane.f32.xlu0 %v409_v55 }
 0x21b   :  { %v390_v60 = vpop.xlane.xlu1 %389 }
 0x21c   :  { %v372_v61 = vpop.xlane.xlu0 %371  ;;  %v469_v25 = vrot.slane %v390_v60, %v1079_v62 }
 0x21d   :  { %v441_v1 = vrot.slane %v372_v61, %v1079_v62 }
 0x21f   :  { %v378_v0 = vpop.xlane.xlu1 %377 }
 0x220   :  { %v369_v32 = vpop.xlane.xlu0 %368 }
 0x221   :  { %v436_v2 = vrot.slane %v369_v32, %v1081_v63 }
 0x223   :  { %v443_v5 = vsel %vm442_vm3, %v441_v1, %v436_v2  ;;  %v396_v6 = vpop.xlane.xlu1 %395 }
 0x224   :  { %v387_v22 = vpop.xlane.xlu0 %386  ;;  %v571_v23 = vmul.f32 %v443_v5, %v926_v7  ;;  %v570_v24 = vmul.f32 %v443_v5, %v912_v3  ;;  %v451_v3 = vrot.slane %v378_v0, %v1079_v62  ;;  %v478_v34 = vrot.slane %v396_v6, %v1079_v62 }
 0x225   :  { %v465_v26 = vrot.slane %v387_v22, %v1081_v63 }
 0x226   :  { %v589_v27 = vsel %vm133_vm1, %v571_v23, 0.0  ;;  %v586_v28 = vsel %vm133_vm1, %v570_v24, 0.0 }
 0x227   :  { %590 = vadd.xlane.f32.xlu1 %v589_v27  ;;  %587 = vadd.xlane.f32.xlu0 %v586_v28  ;;  %v470_v29 = vsel %vm442_vm3, %v469_v25, %v465_v26  ;;  %v375_v30 = vpop.xlane.xlu1 %374 }
 0x228   :  { %v393_v31 = vpop.xlane.xlu0 %392  ;;  %v577_v33 = vmul.f32 %v470_v29, %v931_v8  ;;  %v576_v7 = vmul.f32 %v470_v29, %v917_v4  ;;  %v447_v35 = vrot.slane %v375_v30, %v1081_v63 }
 0x229   :  { %v474_v36 = vrot.slane %v393_v31, %v1081_v63 }
 0x22a   :  { %v607_v37 = vsel %vm133_vm1, %v577_v33, 0.0  ;;  %v604_v38 = vsel %vm133_vm1, %v576_v7, 0.0  ;;  %v452_v39 = vsel %vm442_vm3, %v451_v3, %v447_v35 }
 0x22b   :  { %608 = vadd.xlane.f32.xlu1 %v607_v37  ;;  %605 = vadd.xlane.f32.xlu0 %v604_v38  ;;  %v479_v8 = vsel %vm442_vm3, %v478_v34, %v474_v36  ;;  %v384_v40 = vpop.xlane.xlu1 %383  ;;  %v573_v4 = vmul.f32 %v452_v39, %v952_v11  ;;  %v572_v41 = vmul.f32 %v452_v39, %v936_v9 }
 0x22c   :  { %v381_v42 = vpop.xlane.xlu0 %380  ;;  %v460_v43 = vrot.slane %v384_v40, %v1079_v62  ;;  %v579_v47 = vmul.f32 %v479_v8, %v959_v12  ;;  %v578_v48 = vmul.f32 %v479_v8, %v941_v10 }
 0x22d   :  { %v456_v44 = vrot.slane %v381_v42, %v1081_v63  ;;  %v595_v45 = vsel %vm133_vm1, %v573_v4, 0.0  ;;  %v592_v46 = vsel %vm133_vm1, %v572_v41, 0.0 }
 0x22e   :  { %v613_v52 = vsel %vm133_vm1, %v579_v47, 0.0  ;;  %v610_v21 = vsel %vm133_vm1, %v578_v48, 0.0 }
 0x22f   :  { %596 = vadd.xlane.f32.xlu1 %v595_v45  ;;  %593 = vadd.xlane.f32.xlu0 %v592_v46  ;;  %v461_v49 = vsel %vm442_vm3, %v460_v43, %v456_v44  ;;  %v402_v11 = vpop.xlane.xlu1 %401 }
 0x230   :  { %v399_v50 = vpop.xlane.xlu0 %398  ;;  %v487_v9 = vrot.slane %v402_v11, %v1079_v62  ;;  %v575_v53 = vmul.f32 %v461_v49, %v980_v15  ;;  %v574_v12 = vmul.f32 %v461_v49, %v964_v13 }
 0x231   :  { %v483_v51 = vrot.slane %v399_v50, %v1081_v63 }
 0x232   :  { %v601_v58 = vsel %vm133_vm1, %v575_v53, 0.0  ;;  %v598_v59 = vsel %vm133_vm1, %v574_v12, 0.0 }
 0x233   :  { %614 = vadd.xlane.f32.xlu1 %v613_v52  ;;  %611 = vadd.xlane.f32.xlu0 %v610_v21  ;;  %v488_v10 = vsel %vm442_vm3, %v487_v9, %v483_v51  ;;  %v408_v54 = vpop.xlane.xlu1 %407 }
 0x234   :  { %v405_v55 = vpop.xlane.xlu0 %404  ;;  %v496_v56 = vrot.slane %v408_v54, %v1079_v62  ;;  %v581_v60 = vmul.f32 %v488_v10, %v987_v16  ;;  %v580_v15 = vmul.f32 %v488_v10, %v969_v14 }
 0x235   :  { %v492_v57 = vrot.slane %v405_v55, %v1081_v63 }
 0x236   :  { %v619_v2 = vsel %vm133_vm1, %v581_v60, 0.0  ;;  %v616_v5 = vsel %vm133_vm1, %v580_v15, 0.0 }
 0x237   :  { %602 = vadd.xlane.f32.xlu1 %v601_v58  ;;  %599 = vadd.xlane.f32.xlu0 %v598_v59  ;;  %v497_v13 = vsel %vm442_vm3, %v496_v56, %v492_v57  ;;  %v414_v61 = vpop.xlane.xlu1 %413 }
 0x238   :  { %v411_v0 = vpop.xlane.xlu0 %410  ;;  %v505_v32 = vrot.slane %v414_v61, %v1079_v62  ;;  %v583_v6 = vmul.f32 %v497_v13, %v1003_v18  ;;  %v582_v16 = vmul.f32 %v497_v13, %v992_v17 }
 0x239   :  { %v501_v1 = vrot.slane %v411_v0, %v1081_v63 }
 0x23a   :  { %v625_v22 = vsel %vm133_vm1, %v583_v6, 0.0  ;;  %v622_v23 = vsel %vm133_vm1, %v582_v16, 0.0 }
 0x23b   :  { %620 = vadd.xlane.f32.xlu1 %v619_v2  ;;  %617 = vadd.xlane.f32.xlu0 %v616_v5  ;;  %v506_v14 = vsel %vm442_vm3, %v505_v32, %v501_v1 }
 0x23c   :  { %v585_v24 = vmul.f32 %v506_v14, %v1017_v20  ;;  %v584_v25 = vmul.f32 %v506_v14, %v1008_v19  ;;  %v635_v20 = vstv %s1175_s5  ;;  %s864_s5 = smov [#allocation3]  }
 0x23d   :  { %s755_s10 = sshll.u32 %s864_s5, 4  ;;  %s756_s10 = int_to_ptr.vmem [resolvable:$true] %s755_s10 }
 0x23e   :  { %v631_v26 = vsel %vm133_vm1, %v585_v24, 0.0  ;;  %v628_v18 = vsel %vm133_vm1, %v584_v25, 0.0  ;;  %s842_s11 = scalar_lea.vmem %s756_s10, 128  ;;  %p847_p1 = scmp.lt.s32.totalorder %s756_s10, %s756_s10 }
 0x23f   :  { %626 = vadd.xlane.f32.xlu1 %v625_v22  ;;  %623 = vadd.xlane.f32.xlu0 %v622_v23  ;;  %p843_p0 = scmp.ne.s32.totalorder %s756_s10, %s842_s11  ;;  %p848_p2 = scmp.lt.s32.totalorder %s842_s11, %s842_s11 }
 0x241   :  { %p849_p3 = por %p848_p2, %p847_p1 }
 0x243   :  { %632 = vadd.xlane.f32.xlu1 %v631_v26  ;;  %629 = vadd.xlane.f32.xlu0 %v628_v18  ;;  %p850_p4 = pnand %p849_p3, %p843_p0 }
 0x2b0   :  { %v591_v17 = vpop.xlane.xlu1 %590  ;;  %v588_v27 = vpop.xlane.xlu0 %587 }
 0x2b1   :  { %v637_v34 = vadd.f32 %v635_v20, %v591_v17  ;;  %v636_v35 = vadd.f32 %v635_v20, %v588_v27 }
 0x2b3   :  { %v675_v4 = vrot.slane %v637_v34, %v1079_v62  ;;  %v671_v41 = vrot.slane %v636_v35, %v1081_v63 }
 0x2b4   :  { %v609_v28 = vpop.xlane.xlu1 %608  ;;  %v606_v29 = vpop.xlane.xlu0 %605 }
 0x2b5   :  { %v643_v38 = vadd.f32 %v635_v20, %v609_v28  ;;  %v642_v39 = vadd.f32 %v635_v20, %v606_v29  ;;  %v676_v51 = vsel %vm442_vm3, %v675_v4, %v671_v41 }
 0x2b7   :  { %v702_v47 = vrot.slane %v643_v38, %v1079_v62  ;;  %v698_v48 = vrot.slane %v642_v39, %v1081_v63 }
 0x2b8   :  { %v597_v30 = vpop.xlane.xlu1 %596  ;;  %v594_v31 = vpop.xlane.xlu0 %593 }
 0x2b9   :  { %v639_v33 = vadd.f32 %v635_v20, %v597_v30  ;;  %v638_v19 = vadd.f32 %v635_v20, %v594_v31  ;;  %v703_v54 = vsel %vm442_vm3, %v702_v47, %v698_v48 }
 0x2bb   :  { %v684_v36 = vrot.slane %v639_v33, %v1079_v62  ;;  %v680_v37 = vrot.slane %v638_v19, %v1081_v63 }
 0x2bc   :  { %v615_v7 = vpop.xlane.xlu1 %614  ;;  %v612_v3 = vpop.xlane.xlu0 %611 }
 0x2bd   :  { %v685_v44 = vsel %vm442_vm3, %v684_v36, %v680_v37  ;;  %v645_v49 = vadd.f32 %v635_v20, %v615_v7  ;;  %v644_v11 = vadd.f32 %v635_v20, %v612_v3 }
 0x2be   :  { %v740_v12 = vsel %vm507_vm4, %v685_v44, %v676_v51 }
 0x2bf   :  { %v711_v55 = vrot.slane %v645_v49, %v1079_v62  ;;  %v707_v56 = vrot.slane %v644_v11, %v1081_v63 }
 0x2c0   :  { %v603_v8 = vpop.xlane.xlu1 %602  ;;  %v600_v40 = vpop.xlane.xlu0 %599 }
 0x2c1   :  { %v641_v42 = vadd.f32 %v635_v20, %v603_v8  ;;  %v640_v43 = vadd.f32 %v635_v20, %v600_v40  ;;  %v712_v1 = vsel %vm442_vm3, %v711_v55, %v707_v56 }
 0x2c3   :  { %v693_v45 = vrot.slane %v641_v42, %v1079_v62  ;;  %v689_v46 = vrot.slane %v640_v43, %v1081_v63 }
 0x2c4   :  { %v621_v50 = vpop.xlane.xlu1 %620  ;;  %v618_v9 = vpop.xlane.xlu0 %617 }
 0x2c5   :  { %v694_v52 = vsel %vm442_vm3, %v693_v45, %v689_v46  ;;  %v647_v21 = vadd.f32 %v635_v20, %v621_v50  ;;  %v646_v53 = vadd.f32 %v635_v20, %v618_v9 }
 0x2c6   :  { %v741_v10 = vsel %vm508_vm5, %v694_v52, %v740_v12 }
 0x2c7   :  { %v720_v59 = vrot.slane %v647_v21, %v1079_v62  ;;  %v716_v60 = vrot.slane %v646_v53, %v1081_v63  ;;  %v742_v61 = vsel %vm510_vm6, %v703_v54, %v741_v10 }
 0x2c8   :  { %v627_v57 = vpop.xlane.xlu1 %626  ;;  %v624_v58 = vpop.xlane.xlu0 %623  ;;  %v743_v22 = vsel %vm512_vm7, %v712_v1, %v742_v61 }
 0x2c9   :  { %v649_v15 = vadd.f32 %v635_v20, %v627_v57  ;;  %v648_v13 = vadd.f32 %v635_v20, %v624_v58  ;;  %v721_v6 = vsel %vm442_vm3, %v720_v59, %v716_v60 }
 0x2ca   :  { %v744_v26 = vsel %vm514_vm8, %v721_v6, %v743_v22 }
 0x2cb   :  { %v729_v0 = vrot.slane %v649_v15, %v1079_v62  ;;  %v725_v32 = vrot.slane %v648_v13, %v1081_v63 }
 0x2cc   :  { %v633_v2 = vpop.xlane.xlu1 %632  ;;  %v630_v5 = vpop.xlane.xlu0 %629 }
 0x2cd   :  { %v651_v16 = vadd.f32 %v635_v20, %v633_v2  ;;  %v650_v14 = vadd.f32 %v635_v20, %v630_v5  ;;  %v730_v23 = vsel %vm442_vm3, %v729_v0, %v725_v32 }
 0x2ce   :  { %v745_v17 = vsel %vm516_vm9, %v730_v23, %v744_v26 }
 0x2cf   :  { %v738_v24 = vrot.slane %v651_v16, %v1079_v62  ;;  %v734_v25 = vrot.slane %v650_v14, %v1081_v63 }
 0x2d1   :  { %v739_v18 = vsel %vm442_vm3, %v738_v24, %v734_v25 }
 0x2d2   :  { %v746_v27 = vsel %vm518_vm10, %v739_v18, %v745_v17 }
 0x2d3   :  { %748 = vst.msk [vmem:[#allocation3] sm:$0xff] %vm133_vm1, %v746_v27 }
 0x2d4   :  { %853 = shalt.err (!%p850_p4)
}
 0x2d5   :  { %758 = dma.vmem_to_hbm [thread:$0]  %s756_s10, 128, %s1176_s6, [#allocation4]  }
 0x2d6   :  { %862 = dma.done.wait [#allocation4], 128  }
 0x2d7   :  { %863 = vsyncadd [#allocation4], 4294967168 }
 0x2d8   :  { %762 = vsyncpa [#allocation4], 1 }

</bundles_post_ra>
